<compile_context>
chip_gen: v6e
topology: v6e:2x2x1
jax: 0.10.0
libtpu: 0.0.40
codegen_flags: <defaults>
</compile_context>

<pallas_src>
import jax
import jax.numpy as jnp
from jax.experimental import pallas as pl
from jax.experimental.pallas import tpu as pltpu

NEGATIVE_SLOPE = 1  # matches the module's `negative_slope = 1`

_LANES = 128
_MAX_BLOCK_BYTES = 2 * 1024 * 1024  # ~2 MiB/block; x2 arrays x2 buffers ≈ 8 MiB VMEM


def _sublane(dtype):
    # Minimum sublane tile is dtype-dependent: f32 -> 8, bf16 -> 16, int8/fp8 -> 32.
    itemsize = jnp.dtype(dtype).itemsize
    return max(8, 32 // itemsize)


def _leaky_slab(x2d, negative_slope):
    """where(x > 0, x, slope * x) over a lane-dense (M, N) slab (N % 128 == 0)."""
    M, N = x2d.shape
    itemsize = x2d.dtype.itemsize
    sub = _sublane(x2d.dtype)

    bytes_per_row = N * itemsize
    max_rows = max(sub, ((_MAX_BLOCK_BYTES // bytes_per_row) // sub) * sub)
    tm = M if M <= max_rows else max_rows
    grid = (pl.cdiv(M, tm),)

    def kernel(x_ref, o_ref):
        v1 = x_ref[...]
        o_ref[...] = jnp.where(v1 > 0, v1, v1 * negative_slope).astype(o_ref.dtype)

    return pl.pallas_call(
        kernel,
        out_shape=jax.ShapeDtypeStruct((M, N), x2d.dtype),
        grid_spec=pltpu.PrefetchScalarGridSpec(
            num_scalar_prefetch=0,
            grid=grid,
            in_specs=[pl.BlockSpec((tm, N), lambda i: (i, 0))],
            out_specs=pl.BlockSpec((tm, N), lambda i: (i, 0)),
        ),
        compiler_params=pltpu.CompilerParams(
            dimension_semantics=("parallel",),
        ),
        cost_estimate=pl.CostEstimate(
            flops=2 * M * N,                       # compare + select/mul
            transcendentals=0,
            bytes_accessed=2 * M * N * itemsize,   # read + write
        ),
    )(x2d)


def leaky_identity(x, *, negative_slope=NEGATIVE_SLOPE):
    """Model.forward: identity 'linear' then where(v > 0, v, slope * v)."""
    # TODO(synk): F.linear(x, weight=None) has no valid PyTorch semantics (source
    #             module is from a jit_fail corpus); modeled as the identity map.
    negative_slope = float(negative_slope)
    if negative_slope == 1.0:
        # where(x > 0, x, 1.0 * x) == x bit-exactly (incl. +-0 and NaN): skip all work.
        return x

    orig_shape = x.shape
    total = x.size
    flat = x.reshape(-1)

    main = (total // _LANES) * _LANES
    rem = total - main

    pieces = []
    if main > 0:
        # Prefer a wider lane-dense slab when it divides evenly (fewer descriptors).
        N = _LANES
        for cand in (1024, 512, 256):
            if main % cand == 0:
                N = cand
                break
        slab = _leaky_slab(flat[:main].reshape(main // N, N), negative_slope)
        pieces.append(slab.reshape(-1))
    if rem > 0:
        # < 128-element tail: not worth a masked-store kernel; plain JAX.
        tail = flat[main:]
        pieces.append(jnp.where(tail > 0, tail, tail * negative_slope))

    out = pieces[0] if len(pieces) == 1 else jnp.concatenate(pieces)
    return out.reshape(orig_shape)


if __name__ == "__main__":
    key = jax.random.PRNGKey(0)
    # Shape consistent with the module's example input: (1, 3, 64, 64)
    x1 = jax.random.normal(key, (1, 3, 64, 64), dtype=jnp.float32)

    # --- module semantics: slope = 1 (short-circuit path, bit-exact identity) ---
    out = jax.block_until_ready(leaky_identity(x1, negative_slope=NEGATIVE_SLOPE))
    ref = jnp.where(x1 > 0, x1, x1 * 1.0)
    assert out.shape == x1.shape, (out.shape, x1.shape)
    assert jnp.array_equal(out, ref)

    # --- exercise the Pallas kernel (slope != 1), lane-dense path ---
    out2 = jax.block_until_ready(leaky_identity(x1, negative_slope=0.2))
    ref2 = jnp.where(x1 > 0, x1, x1 * 0.2)
    assert jnp.allclose(out2, ref2, atol=1e-6, rtol=1e-6)

    # --- exercise the non-128-divisible fallback (prefix slab + tiny tail) ---
    x3 = jax.random.normal(jax.random.PRNGKey(1), (5, 31), dtype=jnp.float32)  # 155 elems
    out3 = jax.block_until_ready(leaky_identity(x3, negative_slope=0.2))
    ref3 = jnp.where(x3 > 0, x3, x3 * 0.2)
    assert jnp.allclose(out3, ref3, atol=1e-6, rtol=1e-6)

    print("KERNEL_OK")
</pallas_src>

<mosaic_0001>
module attributes {stable_mosaic.version = 11 : i64} {
  func.func @kernel(%arg0: i32, %arg1: memref<12x1024xf32, #tpu.memory_space<vmem>>, %arg2: memref<12x1024xf32, #tpu.memory_space<vmem>>) attributes {dimension_semantics = [#tpu.dimension_semantics<parallel>], iteration_bounds = array<i64: 1>, scalar_prefetch = 0 : i64, scratch_operands = 0 : i64, tpu.core_type = #tpu.core_type<tc>, window_params = [{transform_indices = @transform_0, window_bounds = array<i64: 12, 1024>}, {transform_indices = @transform_1, window_bounds = array<i64: 12, 1024>}]} {
    %c0 = arith.constant 0 : index
    %c0_0 = arith.constant 0 : index
    %0 = vector.load %arg1[%c0, %c0_0] : memref<12x1024xf32, #tpu.memory_space<vmem>>, vector<12x1024xf32>
    %cst = arith.constant 0.000000e+00 : f32
    %1 = vector.broadcast %cst : f32 to vector<12x1024xf32>
    %2 = arith.cmpf ogt, %0, %1 : vector<12x1024xf32>
    %cst_1 = arith.constant 2.000000e-01 : f32
    %3 = vector.broadcast %cst_1 : f32 to vector<12x1024xf32>
    %4 = arith.mulf %0, %3 : vector<12x1024xf32>
    %5 = arith.select %2, %0, %4 : vector<12x1024xi1>, vector<12x1024xf32>
    %c0_2 = arith.constant 0 : index
    %c0_3 = arith.constant 0 : index
    %6 = vector.load %arg2[%c0_2, %c0_3] : memref<12x1024xf32, #tpu.memory_space<vmem>>, vector<12x1024xf32>
    tpu.vector_store %arg2[%c0_2, %c0_3], %5 {strides = array<i32>} : memref<12x1024xf32, #tpu.memory_space<vmem>>, vector<12x1024xf32>,
    return
  }
  func.func @transform_0(%arg0: i32) -> (i32, i32) {
    %c0_i32 = arith.constant 0 : i32
    %c0_i32_0 = arith.constant 0 : i32
    return %arg0, %c0_i32 : i32, i32
  }
  func.func @transform_1(%arg0: i32) -> (i32, i32) {
    %c0_i32 = arith.constant 0 : i32
    %c0_i32_0 = arith.constant 0 : i32
    return %arg0, %c0_i32 : i32, i32
  }
}

</mosaic_0001>

<bundles_post_ra>
// kernel: tpu_custom_call.1
= control target key start
LH: loop header
LB: loop body
LE: loop exit
PB: predicated region body
PF: predicated region fallthrough
CT: control target
= control target key end

     0   :  { %6 = vsyncpa [#allocation3], 0  ;;  %s194_s0 = inlined_call_operand.hbm [shape: f32[12,1024], index: 0, kind: input, shape index: {}]   ;;  %s195_s1 = inlined_call_operand.hbm [shape: f32[12,1024], index: 1, kind: output, shape index: {}]  }
   0x1   :  { %7 = vsyncpa [#allocation4], 0  ;;  %s168_s6 = smov [#allocation2]  }
   0x2   :  { %s13_s7 = sshll.u32 %s168_s6, 4  ;;  %s14_s7 = int_to_ptr.vmem [resolvable:$true] %s13_s7 }
   0x3   :  { %s132_s8 = scalar_lea.vmem %s14_s7, 2048  ;;  %p137_p1 = scmp.lt.s32.totalorder %s14_s7, %s14_s7 }
   0x4   :  { %p133_p0 = scmp.ne.s32.totalorder %s14_s7, %s132_s8  ;;  %p138_p2 = scmp.lt.s32.totalorder %s132_s8, %s132_s8 }
   0x6   :  { %p139_p3 = por %p138_p2, %p137_p1 }
   0x8   :  { %p140_p4 = pnand %p139_p3, %p133_p0 }
   0xa   :  { %143 = shalt.err (!%p140_p4)
}
   0xb   :  { %s169_s9 = smov 1024   ;;  %s170_s10 = smov 64  }
   0xc   :  { %19 = dma.hbm_to_vmem [thread:$0]  %s194_s0, 2048, %s14_s7, [#allocation3], %s169_s9, %s169_s9, %s170_s10  }
   0xd   :  { %164 = dma.done.wait [#allocation3], 2048  }
   0xe   :  { %165 = vsyncadd [#allocation3], 4294965248  ;;  %v23_v0 = vld [vmem:[#allocation2] sm:$0xff]  ;;  %v24_v1 = vld [vmem:[#allocation2 + $0x8] sm:$0xff]  ;;  %s171_s0 = smov [#allocation5]  }
   0xf   :  { %v25_v2 = vld [vmem:[#allocation2 + $0x10] sm:$0xff]  ;;  %vm39_vm0 = vcmp.gt.f32.partialorder %v23_v0, 0.0  ;;  %v55_v3 = vmul.f32 0.2, %v23_v0  ;;  %vm40_vm1 = vcmp.gt.f32.partialorder %v24_v1, 0.0  ;;  %v26_v6 = vld [vmem:[#allocation2 + $0x18] sm:$0xff] }
  0x10   :  { %v56_v4 = vmul.f32 0.2, %v24_v1  ;;  %vm41_vm2 = vcmp.gt.f32.partialorder %v25_v2, 0.0  ;;  %v57_v5 = vmul.f32 0.2, %v25_v2  ;;  %v27_v7 = vld [vmem:[#allocation2 + $0x20] sm:$0xff] }
  0x11   :  { %v28_v8 = vld [vmem:[#allocation2 + $0x28] sm:$0xff]  ;;  %v71_v9 = vsel %vm39_vm0, %v23_v0, %v55_v3  ;;  %vm42_vm3 = vcmp.gt.f32.partialorder %v26_v6, 0.0  ;;  %v58_v11 = vmul.f32 0.2, %v26_v6  ;;  %v29_v12 = vld [vmem:[#allocation2 + $0x30] sm:$0xff]  ;;  %v30_v13 = vld [vmem:[#allocation2 + $0x38] sm:$0xff] }
  0x12   :  { %v72_v10 = vsel %vm40_vm1, %v24_v1, %v56_v4  ;;  %87 = vst [vmem:[#allocation5] sm:$0xff] %v71_v9  ;;  %v73_v14 = vsel %vm41_vm2, %v25_v2, %v57_v5  ;;  %vm43_vm4 = vcmp.gt.f32.partialorder %v27_v7, 0.0  ;;  %v59_v15 = vmul.f32 0.2, %v27_v7  ;;  %v31_v16 = vld [vmem:[#allocation2 + $0x40] sm:$0xf] }
  0x13   :  { %88 = vst [vmem:[#allocation5 + $0x8] sm:$0xff] %v72_v10  ;;  %vm44_vm5 = vcmp.gt.f32.partialorder %v28_v8, 0.0  ;;  %89 = vst [vmem:[#allocation5 + $0x10] sm:$0xff] %v73_v14  ;;  %v74_v17 = vsel %vm42_vm3, %v26_v6, %v58_v11  ;;  %v60_v18 = vmul.f32 0.2, %v28_v8  ;;  %vm45_vm6 = vcmp.gt.f32.partialorder %v29_v12, 0.0 }
  0x14   :  { %v61_v19 = vmul.f32 0.2, %v29_v12  ;;  %90 = vst [vmem:[#allocation5 + $0x18] sm:$0xff] %v74_v17  ;;  %v75_v20 = vsel %vm43_vm4, %v27_v7, %v59_v15  ;;  %vm46_vm7 = vcmp.gt.f32.partialorder %v30_v13, 0.0  ;;  %v62_v21 = vmul.f32 0.2, %v30_v13 }
  0x15   :  { %vm47_vm8 = vcmp.gt.f32.partialorder %v31_v16, 0.0  ;;  %v32_v22 = vld [vmem:[#allocation2 + $0x48] sm:$0xf]  ;;  %91 = vst [vmem:[#allocation5 + $0x20] sm:$0xff] %v75_v20  ;;  %v76_v23 = vsel %vm44_vm5, %v28_v8, %v60_v18  ;;  %v63_v25 = vmul.f32 0.2, %v31_v16 }
  0x16   :  { %v77_v24 = vsel %vm45_vm6, %v29_v12, %v61_v19  ;;  %vm48_vm9 = vcmp.gt.f32.partialorder %v32_v22, 0.0  ;;  %v33_v26 = vld [vmem:[#allocation2 + $0x50] sm:$0xf]  ;;  %92 = vst [vmem:[#allocation5 + $0x28] sm:$0xff] %v76_v23  ;;  %v78_v27 = vsel %vm46_vm7, %v30_v13, %v62_v21  ;;  %v64_v28 = vmul.f32 0.2, %v32_v22 }
  0x17   :  { %93 = vst [vmem:[#allocation5 + $0x30] sm:$0xff] %v77_v24  ;;  %vm49_vm10 = vcmp.gt.f32.partialorder %v33_v26, 0.0  ;;  %v65_v29 = vmul.f32 0.2, %v33_v26  ;;  %94 = vst [vmem:[#allocation5 + $0x38] sm:$0xff] %v78_v27  ;;  %v79_v30 = vsel %vm47_vm8, %v31_v16, %v63_v25  ;;  %s108_s13 = sshll.u32 %s171_s0, 4  ;;  %s109_s13 = int_to_ptr.vmem [resolvable:$true] %s108_s13 }
  0x18   :  { %v34_v31 = vld [vmem:[#allocation2 + $0x58] sm:$0xf]  ;;  %v35_v32 = vld [vmem:[#allocation2 + $0x60] sm:$0xf]  ;;  %v36_v33 = vld [vmem:[#allocation2 + $0x68] sm:$0xf]  ;;  %v80_v34 = vsel %vm48_vm9, %v32_v22, %v64_v28  ;;  %p149_p6 = scmp.lt.s32.totalorder %s109_s13, %s109_s13 }
  0x19   :  { %95 = vst [vmem:[#allocation5 + $0x40] sm:$0xf] %v79_v30  ;;  %v81_v35 = vsel %vm49_vm10, %v33_v26, %v65_v29  ;;  %vm50_vm11 = vcmp.gt.f32.partialorder %v34_v31, 0.0  ;;  %v66_v36 = vmul.f32 0.2, %v34_v31  ;;  %vm51_vm12 = vcmp.gt.f32.partialorder %v35_v32, 0.0 }
  0x1a   :  { %v37_v37 = vld [vmem:[#allocation2 + $0x70] sm:$0xf]  ;;  %96 = vst [vmem:[#allocation5 + $0x48] sm:$0xf] %v80_v34  ;;  %97 = vst [vmem:[#allocation5 + $0x50] sm:$0xf] %v81_v35 }
  0x1b   :  { %v67_v38 = vmul.f32 0.2, %v35_v32  ;;  %vm52_vm13 = vcmp.gt.f32.partialorder %v36_v33, 0.0  ;;  %v68_v39 = vmul.f32 0.2, %v36_v33  ;;  %v82_v40 = vsel %vm50_vm11, %v34_v31, %v66_v36  ;;  %s144_s14 = scalar_lea.vmem %s109_s13, 2048 }
  0x1c   :  { %vm53_vm14 = vcmp.gt.f32.partialorder %v37_v37, 0.0  ;;  %v69_v41 = vmul.f32 0.2, %v37_v37  ;;  %v38_v42 = vld [vmem:[#allocation2 + $0x78] sm:$0xf]  ;;  %p145_p5 = scmp.ne.s32.totalorder %s109_s13, %s144_s14  ;;  %p150_p7 = scmp.lt.s32.totalorder %s144_s14, %s144_s14 }
  0x1d   :  { %98 = vst [vmem:[#allocation5 + $0x58] sm:$0xf] %v82_v40  ;;  %v83_v43 = vsel %vm51_vm12, %v35_v32, %v67_v38  ;;  %v84_v44 = vsel %vm52_vm13, %v36_v33, %v68_v39  ;;  %vm54_vm15 = vcmp.gt.f32.partialorder %v38_v42, 0.0  ;;  %v70_v45 = vmul.f32 0.2, %v38_v42 }
  0x1e   :  { %99 = vst [vmem:[#allocation5 + $0x60] sm:$0xf] %v83_v43  ;;  %100 = vst [vmem:[#allocation5 + $0x68] sm:$0xf] %v84_v44  ;;  %v85_v46 = vsel %vm53_vm14, %v37_v37, %v69_v41  ;;  %p151_p8 = por %p150_p7, %p149_p6 }
  0x1f   :  { %101 = vst [vmem:[#allocation5 + $0x70] sm:$0xf] %v85_v46  ;;  %v86_v47 = vsel %vm54_vm15, %v38_v42, %v70_v45 }
  0x20   :  { %102 = vst [vmem:[#allocation5 + $0x78] sm:$0xf] %v86_v47  ;;  %p152_p9 = pnand %p151_p8, %p145_p5 }
  0x22   :  { %155 = shalt.err (!%p152_p9)
}
  0x23   :  { %114 = dma.vmem_to_hbm [thread:$0]  %s109_s13, 2048, %s195_s1, [#allocation4], %s169_s9, %s169_s9, %s170_s10  }
  0x24   :  { %166 = dma.done.wait [#allocation4], 2048  }
  0x25   :  { %167 = vsyncadd [#allocation4], 4294965248 }
  0x26   :  { %118 = vsyncpa [#allocation3], 1 }
  0x27   :  { %119 = vsyncpa [#allocation4], 1 }

</bundles_post_ra>
